<compile_context>
chip_gen: v6e
topology: v6e:2x2x1
jax: 0.10.0
libtpu: 0.0.40
codegen_flags: <defaults>
</compile_context>

<pallas_src>
import functools

import jax
import jax.numpy as jnp
from jax.experimental import pallas as pl
from jax.experimental.pallas import tpu as pltpu


def _ce2d_kernel(x_ref, y_ref, out_ref, acc_ref, *, tile_hw, hw_total, needs_mask):
    j = pl.program_id(1)  # spatial-tile (reduction) axis

    @pl.when(j == 0)
    def _():
        acc_ref[...] = jnp.zeros_like(acc_ref)

    x = x_ref[0].astype(jnp.float32)   # (C, tile_hw) logits
    y = y_ref[0].astype(jnp.float32)   # (C, tile_hw) soft labels

    if needs_mask:
        # Mask the ragged tail of the last spatial tile (columns >= H*W). Padded
        # columns get x = 0, y = 0 -> zero contribution to the accumulator.
        col = jax.lax.broadcasted_iota(jnp.int32, (1, tile_hw), 1)
        valid = (j * tile_hw + col) < hw_total          # (1, tile_hw)
        x = jnp.where(valid, x, 0.0)
        y = jnp.where(valid, y, 0.0)

    # Numerically stable log-softmax over the class (sublane) axis.
    m = jnp.max(x, axis=0, keepdims=True)               # (1, tile_hw)
    e = jnp.exp(x - m)                                   # (C, tile_hw)  (EUP)
    s = jnp.sum(e, axis=0, keepdims=True)                # (1, tile_hw)
    log_sm = (x - m) - jnp.log(s)                        # (C, tile_hw)
    # masked_fill(softmax == 0, 1).log(): zero the log term where the softmax
    # element underflows to exactly zero.
    log_sm = jnp.where(e == 0.0, 0.0, log_sm)

    # masked_fill(label == 0, 1).log()
    log_y = jnp.log(jnp.where(y == 0.0, 1.0, y))

    # Hot loop stays on cheap VPU elementwise adds; the big cross-lane reduce
    # happens once per batch item below.
    acc_ref[...] += (log_sm - log_y) * y

    @pl.when(j == pl.num_programs(1) - 1)
    def _():
        out_ref[...] = jnp.full((1, 1, 1), jnp.sum(acc_ref[...]), dtype=jnp.float32)


def cross_entropy_loss_2d(outputs, labels, add_mask=None, *,
                          max_block_bytes=2 * 1024 * 1024, tile_hw=None):
    """outputs, labels: (B, n_cls, H, W) float arrays (soft labels). Returns scalar f32 loss."""
    del add_mask  # unused in the reference forward
    B, C, H, W = outputs.shape
    HW = H * W
    N = B * HW

    # Free reshape: NCHW is already contiguous as (B, C, H*W). No transpose, no pad.
    x = outputs.reshape(B, C, HW)
    y = labels.reshape(B, C, HW)

    if tile_hw is None:
        # ~max_block_bytes of f32 per input block, multiple of 128 lanes.
        cap = max(128, ((max_block_bytes // (C * 4)) // 128) * 128)
        tile_hw = HW if HW <= cap else cap
    n_hw_tiles = pl.cdiv(HW, tile_hw)
    needs_mask = (HW % tile_hw) != 0

    kernel = functools.partial(_ce2d_kernel, tile_hw=tile_hw, hw_total=HW,
                               needs_mask=needs_mask)

    partials = pl.pallas_call(
        kernel,
        out_shape=jax.ShapeDtypeStruct((B, 1, 1), jnp.float32),
        grid_spec=pltpu.PrefetchScalarGridSpec(
            num_scalar_prefetch=0,
            grid=(B, n_hw_tiles),
            in_specs=[
                pl.BlockSpec((1, C, tile_hw), lambda b, j: (b, 0, j)),
                pl.BlockSpec((1, C, tile_hw), lambda b, j: (b, 0, j)),
            ],
            out_specs=pl.BlockSpec((1, 1, 1), lambda b, j: (b, 0, 0)),
            scratch_shapes=[pltpu.VMEM((C, tile_hw), jnp.float32)],
        ),
        compiler_params=pltpu.CompilerParams(
            # Batch axis parallel (v7x megacore); spatial-tile axis is a reduction.
            dimension_semantics=("parallel", "arbitrary"),
        ),
    )(x, y)

    return -jnp.sum(partials) / jnp.float32(N)


def _reference(outputs, labels):
    """Pure-JAX reference mirroring the PyTorch forward exactly."""
    B, C, H, W = outputs.shape
    x = jnp.transpose(outputs, (0, 2, 3, 1)).reshape(B * H * W, C).astype(jnp.float32)
    y = jnp.transpose(labels, (0, 2, 3, 1)).reshape(B * H * W, C).astype(jnp.float32)
    sm = jax.nn.softmax(x, axis=1)
    log_sm = jnp.log(jnp.where(sm == 0.0, 1.0, sm))
    log_y = jnp.log(jnp.where(y == 0.0, 1.0, y))
    return -jnp.sum((log_sm - log_y) * y) / (B * H * W)


if __name__ == "__main__":
    key = jax.random.PRNGKey(0)
    k1, k2, k3, k4 = jax.random.split(key, 4)

    # Test 1: standard small NCHW shapes (single full-width spatial tile per batch).
    B, C, H, W = 2, 4, 16, 16
    outputs = jax.random.normal(k1, (B, C, H, W), dtype=jnp.float32)
    raw = jax.random.uniform(k2, (B, C, H, W), dtype=jnp.float32)
    raw = jnp.where(raw < 0.3, 0.0, raw)                         # introduce exact zeros
    labels = raw / jnp.maximum(jnp.sum(raw, axis=1, keepdims=True), 1e-6)

    loss = cross_entropy_loss_2d(outputs, labels)
    jax.block_until_ready(loss)
    ref = _reference(outputs, labels)
    assert jnp.allclose(loss, ref, rtol=1e-5, atol=1e-5), (loss, ref)

    # Test 2: exercise the multi-tile + ragged-tail (in-kernel masking) path.
    B2, C2, H2, W2 = 1, 4, 18, 18            # H*W = 324 = 2*128 + 68 (ragged)
    outputs2 = jax.random.normal(k3, (B2, C2, H2, W2), dtype=jnp.float32)
    raw2 = jax.random.uniform(k4, (B2, C2, H2, W2), dtype=jnp.float32)
    raw2 = jnp.where(raw2 < 0.3, 0.0, raw2)
    labels2 = raw2 / jnp.maximum(jnp.sum(raw2, axis=1, keepdims=True), 1e-6)

    loss2 = cross_entropy_loss_2d(outputs2, labels2, tile_hw=128)
    jax.block_until_ready(loss2)
    ref2 = _reference(outputs2, labels2)
    assert jnp.allclose(loss2, ref2, rtol=1e-5, atol=1e-5), (loss2, ref2)

    print("KERNEL_OK")
</pallas_src>

<mosaic_0001>
module attributes {stable_mosaic.version = 11 : i64} {
  func.func @_ce2d_kernel(%arg0: i32, %arg1: i32, %arg2: memref<1x4x256xf32, #tpu.memory_space<vmem>>, %arg3: memref<1x4x256xf32, #tpu.memory_space<vmem>>, %arg4: memref<1x1x1xf32, #tpu.memory_space<vmem>>, %arg5: memref<4x256xf32, #tpu.memory_space<vmem>>) attributes {dimension_semantics = [#tpu.dimension_semantics<parallel>, #tpu.dimension_semantics<arbitrary>], iteration_bounds = array<i64: 2, 1>, scalar_prefetch = 0 : i64, scratch_operands = 1 : i64, tpu.core_type = #tpu.core_type<tc>, window_params = [{transform_indices = @transform_0, window_bounds = array<i64: 1, 4, 256>}, {transform_indices = @transform_1, window_bounds = array<i64: 1, 4, 256>}, {transform_indices = @transform_2, window_bounds = array<i64: 1, 1, 1>}]} {
    %c0_i32 = arith.constant 0 : i32
    %0 = arith.cmpi eq, %arg1, %c0_i32 : i32
    %1 = arith.extui %0 : i1 to i32
    %c0_i32_0 = arith.constant 0 : i32
    %2 = arith.cmpi ne, %1, %c0_i32_0 : i32
    scf.if %2 {
      %cst_17 = arith.constant 0.000000e+00 : f32
      %36 = vector.broadcast %cst_17 : f32 to vector<4x256xf32>
      %c0_18 = arith.constant 0 : index
      %c0_19 = arith.constant 0 : index
      %37 = vector.load %arg5[%c0_18, %c0_19] : memref<4x256xf32, #tpu.memory_space<vmem>>, vector<4x256xf32>
      tpu.vector_store %arg5[%c0_18, %c0_19], %36 {strides = array<i32>} : memref<4x256xf32, #tpu.memory_space<vmem>>, vector<4x256xf32>,
    } else {
    }
    %c0 = arith.constant 0 : index
    %c0_1 = arith.constant 0 : index
    %c0_2 = arith.constant 0 : index
    %3 = vector.load %arg2[%c0, %c0_1, %c0_2] : memref<1x4x256xf32, #tpu.memory_space<vmem>>, vector<1x4x256xf32>
    %4 = vector.shape_cast %3 : vector<1x4x256xf32> to vector<4x256xf32>
    %c0_3 = arith.constant 0 : index
    %c0_4 = arith.constant 0 : index
    %c0_5 = arith.constant 0 : index
    %5 = vector.load %arg3[%c0_3, %c0_4, %c0_5] : memref<1x4x256xf32, #tpu.memory_space<vmem>>, vector<1x4x256xf32>
    %6 = vector.shape_cast %5 : vector<1x4x256xf32> to vector<4x256xf32>
    %cst = arith.constant dense<0xFF800000> : vector<256xf32>
    %7 = vector.multi_reduction <maximumf>, %4, %cst [0] : vector<4x256xf32> to vector<256xf32>
    %8 = vector.shape_cast %7 : vector<256xf32> to vector<1x256xf32>
    %9 = vector.broadcast %8 : vector<1x256xf32> to vector<4x256xf32>
    %10 = arith.subf %4, %9 : vector<4x256xf32>
    %11 = math.exp %10 : vector<4x256xf32>
    %cst_6 = arith.constant dense<0.000000e+00> : vector<256xf32>
    %12 = vector.multi_reduction <add>, %11, %cst_6 [0] : vector<4x256xf32> to vector<256xf32>
    %13 = vector.shape_cast %12 : vector<256xf32> to vector<1x256xf32>
    %14 = vector.broadcast %8 : vector<1x256xf32> to vector<4x256xf32>
    %15 = arith.subf %4, %14 : vector<4x256xf32>
    %16 = math.log %13 : vector<1x256xf32>
    %17 = vector.broadcast %16 : vector<1x256xf32> to vector<4x256xf32>
    %18 = arith.subf %15, %17 : vector<4x256xf32>
    %cst_7 = arith.constant 0.000000e+00 : f32
    %19 = vector.broadcast %cst_7 : f32 to vector<4x256xf32>
    %20 = arith.cmpf oeq, %11, %19 : vector<4x256xf32>
    %cst_8 = arith.constant 0.000000e+00 : f32
    %21 = vector.broadcast %cst_8 : f32 to vector<4x256xf32>
    %22 = arith.select %20, %21, %18 : vector<4x256xi1>, vector<4x256xf32>
    %cst_9 = arith.constant 0.000000e+00 : f32
    %23 = vector.broadcast %cst_9 : f32 to vector<4x256xf32>
    %24 = arith.cmpf oeq, %6, %23 : vector<4x256xf32>
    %cst_10 = arith.constant 1.000000e+00 : f32
    %25 = vector.broadcast %cst_10 : f32 to vector<4x256xf32>
    %26 = arith.select %24, %25, %6 : vector<4x256xi1>, vector<4x256xf32>
    %27 = math.log %26 : vector<4x256xf32>
    %c0_11 = arith.constant 0 : index
    %c0_12 = arith.constant 0 : index
    %28 = vector.load %arg5[%c0_11, %c0_12] : memref<4x256xf32, #tpu.memory_space<vmem>>, vector<4x256xf32>
    %29 = arith.subf %22, %27 : vector<4x256xf32>
    %30 = arith.mulf %29, %6 : vector<4x256xf32>
    %31 = arith.addf %28, %30 : vector<4x256xf32>
    %c0_13 = arith.constant 0 : index
    %c0_14 = arith.constant 0 : index
    %32 = vector.load %arg5[%c0_13, %c0_14] : memref<4x256xf32, #tpu.memory_space<vmem>>, vector<4x256xf32>
    tpu.vector_store %arg5[%c0_13, %c0_14], %31 {strides = array<i32>} : memref<4x256xf32, #tpu.memory_space<vmem>>, vector<4x256xf32>,
    %c0_i32_15 = arith.constant 0 : i32
    %33 = arith.cmpi eq, %arg1, %c0_i32_15 : i32
    %34 = arith.extui %33 : i1 to i32
    %c0_i32_16 = arith.constant 0 : i32
    %35 = arith.cmpi ne, %34, %c0_i32_16 : i32
    scf.if %35 {
      %c0_17 = arith.constant 0 : index
      %c0_18 = arith.constant 0 : index
      %36 = vector.load %arg5[%c0_17, %c0_18] : memref<4x256xf32, #tpu.memory_space<vmem>>, vector<4x256xf32>
      %37 = vector.shape_cast %36 : vector<4x256xf32> to vector<1x4x256xf32>
      %cst_19 = arith.constant dense<0.000000e+00> : vector<1xf32>
      %38 = vector.multi_reduction <add>, %37, %cst_19 [1, 2] : vector<1x4x256xf32> to vector<1xf32>
      %39 = vector.shape_cast %38 : vector<1xf32> to vector<1x1x1xf32>
      %40 = vector.extract %39[0, 0, 0] : f32 from vector<1x1x1xf32>
      %41 = vector.broadcast %40 : f32 to vector<1x1x1xf32>
      %c0_20 = arith.constant 0 : index
      %c0_21 = arith.constant 0 : index
      %c0_22 = arith.constant 0 : index
      %42 = vector.load %arg4[%c0_20, %c0_21, %c0_22] : memref<1x1x1xf32, #tpu.memory_space<vmem>>, vector<1x1x1xf32>
      tpu.vector_store %arg4[%c0_20, %c0_21, %c0_22], %41 {strides = array<i32>} : memref<1x1x1xf32, #tpu.memory_space<vmem>>, vector<1x1x1xf32>,
    } else {
    }
    return
  }
  func.func @transform_0(%arg0: i32, %arg1: i32) -> (i32, i32, i32) {
    %c0_i32 = arith.constant 0 : i32
    %c0_i32_0 = arith.constant 0 : i32
    return %arg0, %c0_i32, %arg1 : i32, i32, i32
  }
  func.func @transform_1(%arg0: i32, %arg1: i32) -> (i32, i32, i32) {
    %c0_i32 = arith.constant 0 : i32
    %c0_i32_0 = arith.constant 0 : i32
    return %arg0, %c0_i32, %arg1 : i32, i32, i32
  }
  func.func @transform_2(%arg0: i32, %arg1: i32) -> (i32, i32, i32) {
    %c0_i32 = arith.constant 0 : i32
    %c0_i32_0 = arith.constant 0 : i32
    %c0_i32_1 = arith.constant 0 : i32
    return %arg0, %c0_i32, %c0_i32_0 : i32, i32, i32
  }
}

</mosaic_0001>

<bundles_post_ra>
// kernel: tpu_custom_call.1
= control target key start
LH: loop header
LB: loop body
LE: loop exit
PB: predicated region body
PF: predicated region fallthrough
CT: control target
= control target key end

     0   :  { %7 = vsyncpa [#allocation4], 0  ;;  %s757_s0 = inlined_call_operand.hbm [shape: f32[2,4,256], index: 0, kind: input, shape index: {}]   ;;  %s758_s1 = inlined_call_operand.hbm [shape: f32[2,4,256], index: 1, kind: input, shape index: {}]   ;;  %s759_s2 = inlined_call_operand.vmem [shape: f32[2,1,1], index: 2, kind: output, shape index: {}]  }
   0x1   :  { %9 = vsyncpa [#allocation4 + $0x1], 0 }
   0x2   :  { %10 = vsyncpa [#allocation6], 0 }
   0x3   :  { %12 = vsyncpa [#allocation6 + $0x1], 0  ;;  %s622_s9 = smov 0   ;;  %s624_s10 = smov 0  }
   0x4   :  { %s626_s11 = smov 0   ;;  %s628_s12 = smov 0  }
   0x5   :  { %s630_s13 = smov 0   ;;  %s632_s14 = smov 0  }
   0x6 LB: > { %s405_s15 = sadd.s32 4294967295, %s603_s14   ;;  %s30_s16 = sadd.s32 1, %s599_s13  ;;  %s603_s14 = sphi %s632_s14, %s18_s14   ;;  %s599_s13 = sphi %s630_s13, %s768_s13   ;;  %s595_s12 = sphi %s628_s12, %s767_s12   ;;  %s591_s11 = sphi %s626_s11, %s766_s11   ;;  %s587_s10 = sphi %s624_s10, %s765_s10   ;;  %s583_s9 = sphi %s622_s9, %s764_s9  }
   0x7   : > { %p32_p0 = scmp.ge.s32.totalorder %s30_s16, 2  ;;  %s39_s17 = sadd.s32 1, %s591_s11 }
   0x8   : > { %p46_p1 = scmp.ne.s32.totalorder %s591_s11, %s587_s10  ;;  %p47_p2 = scmp.eq.s32.totalorder %s603_s14, 0 }
   0x9   : > { %s770_s16 = smov (%p32_p0, %s30_s16), 0  ;;  %p52_p4 = scmp.ne.s32.totalorder %s587_s10, %s583_s9 }
   0xa   : > { %p658_p3 = por %p47_p2, %p46_p1  ;;  %s34_s19 = ssub.s32 %s599_s13, %s770_s16 }
   0xb   : > { %p53_p5 = scmp.eq.s32.totalorder %s405_s15, 0  ;;  %p37_p6 = scmp.eq.s32.totalorder %s34_s19, 0 }
   0xc   : > { %p435_p8 = scmp.lt.s32.totalorder %s603_s14, 2  ;;  %s674_s22 = sand.u32 1, %s591_s11  }
   0xd   : > { %p665_p7 = por %p53_p5, %p52_p4  ;;  %s420_s23 = sshll.u32 %s599_s13, 7 }
   0xe   : > { %s671_s21 = scalar_select %p37_p6, %s591_s11, %s39_s17  }
   0xf   : > { %s409_s24 = sshll.u32 %s674_s22, 3  ;;  %s142_s27 = scalar_lea.hbm %s757_s0, %s420_s23 }
  0x10   : > { %s134_s28 = scalar_lea.vmem [#allocation3], %s409_s24  ;;  %p683_p9 = pnand %p435_p8, %p658_p3 }
  0x11   : > { %s144_s29 = sshll.u32 %s134_s28, 4  ;;  %p415_p10 = scmp.ge.s32.totalorder %s603_s14, 1  ;;  %s145_s29 = int_to_ptr.vmem [resolvable:$true] %s144_s29 }
  0x12   : > { %p170_p11 = scmp.lt.s32.totalorder %s603_s14, 3  ;;  %s131_s3 = scalar_lea.sflag [#allocation4], %s674_s22 }
  0x13   : > { %p495_p12 = pneg %p683_p9  ;;  %s506_s4 = scalar_lea.vmem %s145_s29, 128 }
  0x14   : > { %p507_p13 = scmp.ne.s32.totalorder %s145_s29, %s506_s4  ;;  %s605_s5 = smov [#allocation3]  }
  0x15   : > { %s511_s6 = sshll.u32 %s605_s5, 4  ;;  %s512_s6 = int_to_ptr.vmem [resolvable:$false] %s511_s6 }
  0x16   : > { %p509_p0 = pnand %p507_p13, %p495_p12  ;;  %s513_s7 = scalar_lea.vmem %s512_s6, 256 }
  0x17   : > { %p514_p2 = scmp.lt.s32.totalorder %s145_s29, %s512_s6  ;;  %p515_p3 = scmp.lt.s32.totalorder %s513_s7, %s506_s4 }
  0x18   : > { %p510_p1 = pneg %p509_p0 }
  0x19   : > { %p516_p4 = por %p515_p3, %p514_p2 }
  0x1b   : > { %p517_p5 = pnand %p516_p4, %p510_p1 }
  0x1d   : > { %520 = shalt.err (!%p517_p5)
}
  0x1e   : > { %431 = dma.hbm_to_vmem [thread:$0]  (!%p683_p9), %s142_s27, 128, %s145_s29, %s131_s3  }
  0x1f   : > { %p701_p6 = pnand %p415_p10, %p170_p11  ;;  %s163_s17 = scalar_lea.hbm %s758_s1, %s420_s23 }
  0x20   : > { %s155_s18 = scalar_lea.vmem [#allocation5], %s409_s24  ;;  %s152_s25 = scalar_lea.sflag [#allocation6], %s674_s22 }
  0x21   : > { %s165_s19 = sshll.u32 %s155_s18, 4  ;;  %s606_s27 = smov [#allocation5]   ;;  %s166_s19 = int_to_ptr.vmem [resolvable:$true] %s165_s19 }
  0x22   : > { %s534_s26 = scalar_lea.vmem %s166_s19, 128  ;;  %s539_s28 = sshll.u32 %s606_s27, 4  ;;  %s540_s28 = int_to_ptr.vmem [resolvable:$false] %s539_s28 }
  0x23   : > { %p535_p8 = scmp.ne.s32.totalorder %s166_s19, %s534_s26  ;;  %s541_s29 = scalar_lea.vmem %s540_s28, 256 }
  0x24   : > { %p542_p10 = scmp.lt.s32.totalorder %s166_s19, %s540_s28  ;;  %p543_p11 = scmp.lt.s32.totalorder %s541_s29, %s534_s26 }
  0x25   : > { %p537_p13 = pnand %p535_p8, %p495_p12 }
  0x26   : > { %p544_p1 = por %p543_p11, %p542_p10 }
  0x27   : > { %p538_p0 = pneg %p537_p13 }
  0x29   : > { %p545_p2 = pnand %p544_p1, %p538_p0 }
  0x2b   : > { %548 = shalt.err (!%p545_p2)
}
  0x2c   : > { %434 = dma.hbm_to_vmem [thread:$0]  (!%p683_p9), %s163_s17, 128, %s166_s19, %s152_s25  }
  0x2d   : > { %174 = sbr.rel (%p701_p6) target bundleno = 336 (0x150), region = 28  ;;  %s176_s22 = sand.u32 (!%p701_p6), 1, %s587_s10  }
  0x2e   : > { %s416_s23 = sshll.u32 (!%p701_p6), %s176_s22, 3  ;;  %s177_s24 = scalar_lea.sflag (!%p701_p6), [#allocation4], %s176_s22 }
  0x2f   : > { %s180_s3 = scalar_lea.vmem (!%p701_p6), [#allocation3], %s416_s23 }
  0x32   : > { %574 = dma.done.wait (%p665_p7), %s177_s24, 128  }
  0x33   : > { %576 = vsyncadd (%p665_p7), %s177_s24, 4294967168  ;;  %s186_s4 = scalar_lea.sflag [#allocation6], %s176_s22  ;;  %s721_s5 = scalar_lea.vmem [#allocation5], %s416_s23 }
  0x34   : > { %578 = dma.done.wait (%p665_p7), %s186_s4, 128  }
  0x35   : > { %580 = vsyncadd (%p665_p7), %s186_s4, 4294967168  ;;  %vm228_vm0 = vcmask 1043456   ;;  %v223_v0 = vld [vmem:[%s180_s3] sm:$0xff]  ;;  %v224_v28 = vld [vmem:[%s721_s5] sm:$0xff]  ;;  %p215_p7 = scmp.lt.s32.totalorder %s595_s12, 1  ;;  %vm307_vm3 = vcmask 0  }
  0x36   : > { %v226_v1 = vcombine.high %v223_v0, %v223_v0  ;;  %v229_v2 = vsel %vm228_vm0, %v223_v0, -inf  ;;  %vm278_vm1 = vcmp.eq.f32.partialorder %v224_v28, 0.0 }
  0x37   : > { %v230_v3 = vrot.slane %v229_v2, 4  ;;  %v279_v36 = vsel %vm278_vm1, 1.0, %v224_v28  ;;  %s772_s12 = smov (!%p215_p7, %s595_s12), 1 }
  0x38   : > { %v236_v4 = vsel %vm228_vm0, %v226_v1, -inf  ;;  %s217_s6 = scalar_lea.vmem %s759_s2, %s772_s12 }
  0x39   : > { %v231_v5 = vmax.f32 %v229_v2, %v230_v3  ;;  %v237_v6 = vrot.slane %v236_v4, 4 }
  0x3b   : > { %v232_v7 = vrot.slane %v231_v5, 2  ;;  %v238_v8 = vmax.f32 %v236_v4, %v237_v6 }
  0x3d   : > { %v233_v9 = vmax.f32 %v231_v5, %v232_v7  ;;  %v239_v10 = vrot.slane %v238_v8, 2 }
  0x3f   : > { %v234_v11 = vrot.slane %v233_v9, 1  ;;  %v240_v12 = vmax.f32 %v238_v8, %v239_v10 }
  0x41   : > { %v235_v13 = vmax.f32 %v233_v9, %v234_v11  ;;  %v241_v14 = vrot.slane %v240_v12, 1 }
  0x43   : > { %v242_v15 = vmax.f32 %v240_v12, %v241_v14 }
  0x45   : > { %v245_v16 = vcombine.low %v235_v13, %v242_v15 }
  0x47   : > { %v247_v17 = vsub.f32 %v223_v0, %v245_v16 }
  0x49   : > { %v248_v18 = vmul.f32 1.442695, %v247_v17 }
  0x4b   : > { %485 = vpow2.f32 %v248_v18 }
  0x58   : > { %v486_v19 = vpop.eup %485 }
  0x59   : > { %v251_v20 = vcombine.high %v486_v19, %v486_v19  ;;  %v253_v21 = vsel %vm228_vm0, %v486_v19, 0.0  ;;  %vm276_vm2 = vcmp.eq.f32.partialorder %v486_v19, 0.0 }
  0x5a   : > { %v254_v22 = vrot.slane %v253_v21, 4 }
  0x5b   : > { %v260_v23 = vsel %vm228_vm0, %v251_v20, 0.0 }
  0x5c   : > { %v255_v24 = vadd.f32 %v254_v22, %v253_v21  ;;  %v261_v25 = vrot.slane %v260_v23, 4 }
  0x5e   : > { %v256_v26 = vrot.slane %v255_v24, 2  ;;  %v262_v27 = vadd.f32 %v261_v25, %v260_v23 }
  0x60   : > { %v257_v29 = vadd.f32 %v256_v26, %v255_v24  ;;  %v263_v30 = vrot.slane %v262_v27, 2 }
  0x62   : > { %v258_v31 = vrot.slane %v257_v29, 1  ;;  %v264_v32 = vadd.f32 %v263_v30, %v262_v27 }
  0x64   : > { %v259_v33 = vadd.f32 %v258_v31, %v257_v29  ;;  %v265_v34 = vrot.slane %v264_v32, 1 }
  0x66   : > { %v266_v35 = vadd.f32 %v265_v34, %v264_v32  ;;  %487 = vlog2.f32 %v259_v33 }
  0x68   : > { %489 = vlog2.f32 %v266_v35 }
  0x69   : > { %491 = vlog2.f32 %v279_v36 }
  0x73   : > { %v488_v37 = vpop.eup %487 }
  0x74   : > { %v268_v38 = vmul.f32 0.6931472, %v488_v37 }
  0x75   : > { %v490_v39 = vpop.eup %489 }
  0x76   : > { %v492_v40 = vpop.eup %491  ;;  %v270_v41 = vmul.f32 0.6931472, %v490_v39 }
  0x77   : > { %v281_v43 = vmul.f32 0.6931472, %v492_v40 }
  0x78   : > { %v273_v42 = vcombine.low %v268_v38, %v270_v41 }
  0x7a   : > { %v275_v44 = vsub.f32 %v247_v17, %v273_v42 }
  0x7c   : > { %v277_v45 = vsel %vm276_vm2, 0.0, %v275_v44 }
  0x7d   : > { %v283_v46 = vsub.f32 %v277_v45, %v281_v43 }
  0x7f   : > { %v284_v47 = vmul.f32 %v283_v46, %v224_v28 }
  0x81   : > { %v292_v48 = vcombine.high %v284_v47, %v284_v47  ;;  %v294_v49 = vsel %vm228_vm0, %v284_v47, 0.0 }
  0x83   : > { %v295_v50 = vsel %vm228_vm0, %v292_v48, 0.0 }
  0x84   : > { %v296_v51 = vadd.f32 %v295_v50, %v294_v49 }
  0x86   : > { %297 = vadd.xlane.f32.xlu0 %v296_v51 }
 0x10f   : > { %v298_v52 = vpop.xlane.xlu0 %297 }
 0x110   : > { %v299_v53 = vrot.slane %v298_v52, 4 }
 0x112   : > { %v300_v54 = vadd.f32 %v299_v53, %v298_v52 }
 0x114   : > { %v301_v55 = vrot.slane %v300_v54, 2 }
 0x116   : > { %v302_v56 = vadd.f32 %v301_v55, %v300_v54 }
 0x118   : > { %v303_v57 = vrot.slane %v302_v56, 1 }
 0x11a   : > { %v304_v58 = vadd.f32 %v303_v57, %v302_v56 }
 0x11c   : > { %422 = vpush %v304_v58 }
 0x14d   : > { %s423_s7 = spop %422 }
 0x14e   : > { %v306_v59 = vstv %s423_s7 }
 0x14f   : > { %308 = vst.msk [vmem:[%s217_s6] sm:$0x1] %vm307_vm3, %v306_v59 }
 0x150 PF: > { %s18_s14 = sadd.s32 1, %s603_s14   ;;  %s764_s9 = smov %s587_s10 }
 0x151   : > { %p15_p9 = scmp.ge.s32.totalorder %s18_s14, 4   ;;  %s765_s10 = smov %s591_s11 }
 0x152   : > { %s766_s11 = smov %s671_s21  ;;  %s767_s12 = smov %s599_s13 }
 0x153   : > { %s768_s13 = smov %s770_s16  ;;  %17 = sbr.rel (!%p15_p9) target bundleno = 6 (0x6), region = 89 }
 0x158   :  { %326 = vsyncpa [#allocation4], 1 }
 0x159   :  { %328 = vsyncpa [#allocation4 + $0x1], 1 }
 0x15a   :  { %329 = vsyncpa [#allocation6], 1 }
 0x15b   :  { %331 = vsyncpa [#allocation6 + $0x1], 1 }

</bundles_post_ra>
